<compile_context>
chip_gen: v7x
topology: tpu7x:2x2x1
jax: 0.10.0
libtpu: 0.0.40
codegen_flags: <defaults>
</compile_context>

<pallas_src>
import functools

import jax
import jax.numpy as jnp
from jax.experimental import pallas as pl
from jax.experimental.pallas import tpu as pltpu

_LANE = 128
_SUBLANE = 8


def _layernorm2d_kernel(x_ref, o_ref, *, epsilon, inv_n):
    # Block is (b_tile, CHW/128, 128) (preferred) or (b_tile, CHW) (fallback).
    # Normalization is per sample -> reduce over every axis except axis 0.
    x = x_ref[...].astype(jnp.float32)
    red_axes = tuple(range(1, x.ndim))
    mean = jnp.sum(x, axis=red_axes, keepdims=True) * inv_n
    centered = x - mean
    # unbiased=False in the reference -> biased variance (divide by N).
    var = jnp.sum(centered * centered, axis=red_axes, keepdims=True) * inv_n
    inv_std = jax.lax.rsqrt(var + epsilon)
    # x*inv_std - mean*inv_std: `centered` is not live at store time.
    o_ref[...] = (x * inv_std - mean * inv_std).astype(o_ref.dtype)


def _vmem_capacity_bytes():
    """Per-core VMEM capacity; conservative (v7x) fallback if query fails."""
    try:
        return int(pltpu.get_tpu_info().vmem_capacity_bytes)
    except Exception:
        return 64 << 20


def _pick_batch_tile(n, chw, itemsize, block_budget_bytes):
    """Batch rows per grid step that fit the block budget.

    Accounts for Pallas double-buffering of BOTH the input and output block
    (4 * itemsize per element) plus ~3 f32 temporaries inside the kernel.
    """
    per_row = chw * (4 * itemsize + 3 * 4)
    max_rows = max(1, block_budget_bytes // per_row)
    b_tile = min(n, max_rows)
    if n >= 2:
        # Guarantee >= 2 grid steps so v7x's second TensorCore gets work
        # (dimension_semantics=("parallel",)); negligible cost on v5e/v6e.
        b_tile = min(b_tile, pl.cdiv(n, 2))
    if b_tile >= _SUBLANE:
        b_tile = (b_tile // _SUBLANE) * _SUBLANE
    return max(1, b_tile)


def layernorm2d(x, gamma, beta, epsilon=1e-5):
    """Pallas implementation of LayerNormm2D.forward.

    NOTE: the reference forward() never applies gamma/beta, so neither do we;
    they are accepted only to mirror the module's parameter set.
    """
    assert x.ndim == 4
    n, c, h, w = x.shape
    del gamma, beta  # unused by the reference forward pass
    chw = c * h * w
    itemsize = x.dtype.itemsize

    capacity = _vmem_capacity_bytes()
    block_budget = max(2 << 20, capacity // 8)       # ~16 MiB v5e/v6e, ~8 MiB v7x
    vmem_limit = (capacity * 3) // 4                 # ~96 MiB v5e/v6e, ~48 MiB v7x

    b_tile = _pick_batch_tile(n, chw, itemsize, block_budget)
    # TODO(synk): add a CHW-chunked two-pass path (second 'arbitrary' grid axis
    # with partial sum/sumsq scratch) for feature maps whose single row exceeds
    # the VMEM budget; today such rows fall back to one oversized block.

    if chw % _LANE == 0:
        # Sublane-packed view: each sample is (CHW/128) sublane rows x 128
        # lanes, so even b_tile=1 fully packs vregs.
        rows = chw // _LANE
        x_in = x.reshape(n, rows, _LANE)
        block = (b_tile, rows, _LANE)
        index_map = lambda i: (i, 0, 0)
    else:
        # Fallback 2-D layout; keep the batch tile sublane-aligned (or the
        # whole batch) so the block layout stays legal.
        if b_tile % _SUBLANE != 0 and b_tile != n:
            b_tile = min(n, pl.cdiv(b_tile, _SUBLANE) * _SUBLANE)
        x_in = x.reshape(n, chw)
        block = (b_tile, chw)
        index_map = lambda i: (i, 0)

    grid = (pl.cdiv(n, b_tile),)

    kernel = functools.partial(
        _layernorm2d_kernel, epsilon=epsilon, inv_n=1.0 / float(chw))

    cost = pl.CostEstimate(
        flops=6 * n * chw,
        transcendentals=n,
        bytes_accessed=2 * n * chw * itemsize)

    out = pl.pallas_call(
        kernel,
        out_shape=jax.ShapeDtypeStruct(x_in.shape, x.dtype),
        grid=grid,
        in_specs=[pl.BlockSpec(block, index_map)],
        out_specs=pl.BlockSpec(block, index_map),
        compiler_params=pltpu.CompilerParams(
            dimension_semantics=("parallel",),
            vmem_limit_bytes=int(vmem_limit),
        ),
        cost_estimate=cost,
    )(x_in)
    return out.reshape(n, c, h, w)


def layernorm2d_ref(x, epsilon=1e-5):
    xf = x.astype(jnp.float32)
    mean = jnp.mean(xf, axis=(1, 2, 3), keepdims=True)
    var = jnp.mean((xf - mean) ** 2, axis=(1, 2, 3), keepdims=True)
    return ((xf - mean) / jnp.sqrt(var + epsilon)).astype(x.dtype)


if __name__ == "__main__":
    key = jax.random.PRNGKey(0)
    N, C, H, W = 2, 4, 16, 16
    x = jax.random.normal(key, (N, C, H, W), dtype=jnp.float32)

    # Deterministic parameter init matching nn.Parameter(torch.ones/zeros).
    gamma = jnp.ones((C,), dtype=jnp.float32)
    beta = jnp.zeros((C,), dtype=jnp.float32)

    out = layernorm2d(x, gamma, beta, epsilon=1e-5)
    out = jax.block_until_ready(out)

    ref = layernorm2d_ref(x, epsilon=1e-5)
    assert out.shape == x.shape and out.dtype == x.dtype
    assert jnp.allclose(out, ref, atol=1e-5, rtol=1e-5)
    print("KERNEL_OK")
</pallas_src>

<mosaic_0001>
module attributes {stable_mosaic.version = 11 : i64} {
  func.func @_layernorm2d_kernel(%arg0: i32, %arg1: memref<1x8x128xf32, #tpu.memory_space<vmem>>, %arg2: memref<1x8x128xf32, #tpu.memory_space<vmem>>) attributes {dimension_semantics = [#tpu.dimension_semantics<parallel>], iteration_bounds = array<i64: 2>, scalar_prefetch = 0 : i64, scratch_operands = 0 : i64, tpu.core_type = #tpu.core_type<tc>, window_params = [{transform_indices = @transform_0, window_bounds = array<i64: 1, 8, 128>}, {transform_indices = @transform_1, window_bounds = array<i64: 1, 8, 128>}]} {
    %c0 = arith.constant 0 : index
    %c0_0 = arith.constant 0 : index
    %c0_1 = arith.constant 0 : index
    %0 = vector.load %arg1[%c0, %c0_0, %c0_1] : memref<1x8x128xf32, #tpu.memory_space<vmem>>, vector<1x8x128xf32>
    %cst = arith.constant dense<0.000000e+00> : vector<1xf32>
    %1 = vector.multi_reduction <add>, %0, %cst [1, 2] : vector<1x8x128xf32> to vector<1xf32>
    %2 = vector.shape_cast %1 : vector<1xf32> to vector<1x1x1xf32>
    %cst_2 = arith.constant 9.765625E-4 : f32
    %3 = vector.broadcast %cst_2 : f32 to vector<1x1x1xf32>
    %4 = arith.mulf %2, %3 : vector<1x1x1xf32>
    %5 = vector.broadcast %4 : vector<1x1x1xf32> to vector<1x8x128xf32>
    %6 = arith.subf %0, %5 : vector<1x8x128xf32>
    %7 = arith.mulf %6, %6 : vector<1x8x128xf32>
    %cst_3 = arith.constant dense<0.000000e+00> : vector<1xf32>
    %8 = vector.multi_reduction <add>, %7, %cst_3 [1, 2] : vector<1x8x128xf32> to vector<1xf32>
    %9 = vector.shape_cast %8 : vector<1xf32> to vector<1x1x1xf32>
    %cst_4 = arith.constant 9.765625E-4 : f32
    %10 = vector.broadcast %cst_4 : f32 to vector<1x1x1xf32>
    %11 = arith.mulf %9, %10 : vector<1x1x1xf32>
    %cst_5 = arith.constant 9.99999974E-6 : f32
    %12 = vector.broadcast %cst_5 : f32 to vector<1x1x1xf32>
    %13 = arith.addf %11, %12 : vector<1x1x1xf32>
    %14 = math.rsqrt %13 : vector<1x1x1xf32>
    %15 = vector.broadcast %14 : vector<1x1x1xf32> to vector<1x8x128xf32>
    %16 = arith.mulf %0, %15 : vector<1x8x128xf32>
    %17 = arith.mulf %4, %14 : vector<1x1x1xf32>
    %18 = vector.broadcast %17 : vector<1x1x1xf32> to vector<1x8x128xf32>
    %19 = arith.subf %16, %18 : vector<1x8x128xf32>
    %c0_6 = arith.constant 0 : index
    %c0_7 = arith.constant 0 : index
    %c0_8 = arith.constant 0 : index
    %20 = vector.load %arg2[%c0_6, %c0_7, %c0_8] : memref<1x8x128xf32, #tpu.memory_space<vmem>>, vector<1x8x128xf32>
    tpu.vector_store %arg2[%c0_6, %c0_7, %c0_8], %19 {strides = array<i32>} : memref<1x8x128xf32, #tpu.memory_space<vmem>>, vector<1x8x128xf32>,
    return
  }
  func.func @transform_0(%arg0: i32) -> (i32, i32, i32) {
    %c0_i32 = arith.constant 0 : i32
    %c0_i32_0 = arith.constant 0 : i32
    %c0_i32_1 = arith.constant 0 : i32
    return %arg0, %c0_i32, %c0_i32_0 : i32, i32, i32
  }
  func.func @transform_1(%arg0: i32) -> (i32, i32, i32) {
    %c0_i32 = arith.constant 0 : i32
    %c0_i32_0 = arith.constant 0 : i32
    %c0_i32_1 = arith.constant 0 : i32
    return %arg0, %c0_i32, %c0_i32_0 : i32, i32, i32
  }
}

</mosaic_0001>

<bundles_post_ra>
// kernel: tpu_custom_call.1
= control target key start
LH: loop header
LB: loop body
LE: loop exit
PB: predicated region body
PF: predicated region fallthrough
CT: control target
= control target key end

     0   :  { %6 = vsyncpa [#allocation3], 0  ;;  %s578_s0 = inlined_call_operand.hbm [shape: f32[2,8,128], index: 0, kind: input, shape index: {}]   ;;  %s579_s1 = inlined_call_operand.hbm [shape: f32[2,8,128], index: 1, kind: output, shape index: {}]  }
   0x1   :  { %8 = vsyncpa [#allocation3 + $0x1], 0 }
   0x2   :  { %9 = vsyncpa [#allocation4], 0 }
   0x3   :  { %11 = vsyncpa [#allocation4 + $0x1], 0  ;;  %s413_s6 = smov 0   ;;  %s415_s7 = smov 0  }
   0x4   :  { %s417_s8 = smov 0   ;;  %s419_s9 = smov 0  }
   0x5 LB: > { %s434_s10 = sadd.s32 4294967295, %s399_s9   ;;  %s243_s11 = sadd.s32 4294967294, %s399_s9   ;;  %s399_s9 = sphi %s419_s9, %s594_s9   ;;  %s395_s8 = sphi %s417_s8, %s593_s8   ;;  %s391_s7 = sphi %s415_s7, %s592_s7   ;;  %s387_s6 = sphi %s413_s6, %s591_s6  }
   0x6   : > { %s438_s12 = sadd.s32 1, %s399_s9   ;;  %s24_s13 = sadd.s32 1, %s395_s8 }
   0x7   : > { %s21_s14 = ssub.s32 %s399_s9, %s438_s12  ;;  %p31_p0 = scmp.ne.s32.totalorder %s395_s8, %s391_s7 }
   0x8   : > { %p22_p1 = scmp.eq.s32.totalorder %s21_s14, 0  ;;  %p32_p2 = scmp.eq.s32.totalorder %s399_s9, 0 }
   0x9   : > { %p37_p3 = scmp.ne.s32.totalorder %s391_s7, %s387_s6  ;;  %p38_p4 = scmp.eq.s32.totalorder %s434_s10, 0 }
   0xa   : > { %s450_s15 = scalar_select %p22_p1, %s395_s8, %s24_s13  }
   0xb   : > { %p452_p5 = por %p32_p2, %p31_p0  ;;  %p456_p6 = por %p38_p4, %p37_p3 }
   0xc   : > { %p61_p7 = scmp.eq.s32.totalorder %s434_s10, 1  ;;  %p67_p8 = scmp.eq.s32.totalorder %s243_s11, 1 }
   0xd   : > { %p267_p10 = scmp.lt.s32.totalorder %s399_s9, 2  ;;  %s87_s20 = sand.u32 1, %s395_s8  }
   0xe   : > { %p463_p11 = por %p61_p7, %p31_p0  ;;  %p467_p12 = por %p67_p8, %p37_p3 }
   0xf   : > { %s247_s21 = sshll.u32 %s399_s9, 7  ;;  %s246_s22 = sshll.u32 %s87_s20, 3 }
  0x10   : > { %s583_s18 = scalar_select %p463_p11, 1, 0 }
  0x11   : > { %s584_s19 = scalar_select %p467_p12, 1, 0 }
  0x12   : > { %s476_s25 = scalar_lea.hbm %s578_s0, %s247_s21  ;;  %s91_s26 = scalar_lea.vmem [#allocation2], %s246_s22 }
  0x13   : > { %s98_s27 = sshll.u32 %s91_s26, 4  ;;  %p480_p13 = pnand %p267_p10, %p452_p5  ;;  %s484_s27 = int_to_ptr.vmem [resolvable:$true] %s98_s27 }
  0x14   : > { %s88_s29 = scalar_lea.sflag [#allocation3], %s87_s20  ;;  %s303_s30 = scalar_lea.hbm %s476_s25, 128 }
  0x15   : > { %p304_p2 = scmp.ne.s32.totalorder %s476_s25, %s303_s30  ;;  %p305_p3 = pneg %p480_p13 }
  0x16   : > { %s308_s4 = scalar_lea.hbm %s578_s0, 256  ;;  %p309_p5 = scmp.lt.u32.totalorder %s476_s25, %s578_s0 }
  0x17   : > { %p306_p4 = pnand %p305_p3, %p304_p2  ;;  %p310_p8 = scmp.lt.u32.totalorder %s308_s4, %s303_s30 }
  0x18   : > { %p312_p9 = scmp.lt.u32.totalorder %s303_s30, %s476_s25 }
  0x19   : > { %p307_p7 = pneg %p306_p4  ;;  %p311_p10 = por %p310_p8, %p309_p5 }
  0x1b   : > { %p313_p0 = por %p312_p9, %p311_p10 }
  0x1d   : > { %p314_p1 = pnand %p313_p0, %p307_p7 }
  0x1f   : > { %317 = shalt.err (!%p314_p1)
}
  0x20   : > { %s318_s13 = scalar_lea.vmem %s484_s27, 128  ;;  %s401_s14 = smov [#allocation2]  }
  0x21   : > { %p319_p2 = scmp.ne.s32.totalorder %s484_s27, %s318_s13  ;;  %s323_s16 = sshll.u32 %s401_s14, 4  ;;  %s324_s16 = int_to_ptr.vmem [resolvable:$false] %s323_s16 }
  0x22   : > { %s325_s20 = scalar_lea.vmem %s324_s16, 256  ;;  %p326_p11 = scmp.lt.s32.totalorder %s484_s27, %s324_s16 }
  0x23   : > { %p321_p4 = pnand %p319_p2, %p305_p3  ;;  %p327_p5 = scmp.lt.s32.totalorder %s325_s20, %s318_s13 }
  0x25   : > { %p322_p12 = pneg %p321_p4  ;;  %p328_p8 = por %p327_p5, %p326_p11 }
  0x27   : > { %p329_p9 = pnand %p328_p8, %p322_p12 }
  0x29   : > { %332 = shalt.err (!%p329_p9)
}
  0x2a   : > { %262 = dma.hbm_to_vmem [thread:$0]  (!%p480_p13), %s476_s25, 128, %s484_s27, %s88_s29  }
  0x2b   : > { %p586_p0 = scmp.lt.s32.totalorder %s399_s9, 3  ;;  %p587_p1 = scmp.ge.s32.totalorder %s399_s9, 1 }
  0x2d   : > { %p104_p3 = pnand %p587_p1, %p586_p0 }
  0x2e   : > { %s518_s21 = sand.u32 (!%p104_p3), 1, %s391_s7  }
  0x2f   : > { %107 = sbr.rel (%p104_p3) target bundleno = 403 (0x193), region = 24  ;;  %s249_s22 = sshll.u32 (!%p104_p3), %s518_s21, 3 }
  0x30   : > { %s110_s23 = scalar_lea.sflag (!%p104_p3), [#allocation3], %s518_s21  ;;  %s113_s24 = scalar_lea.vmem (!%p104_p3), [#allocation2], %s249_s22 }
  0x36   : > { %378 = dma.done.wait (%p456_p6), %s110_s23, 128  }
  0x37   : > { %380 = vsyncadd (%p456_p6), %s110_s23, 4294967168  ;;  %v132_v0 = vld [vmem:[%s113_s24] sm:$0xff]  ;;  %s252_s17 = sshll.u32 %s434_s10, 7  ;;  %s131_s25 = scalar_lea.vmem [#allocation5], %s249_s22 }
  0x38   : > { %133 = vadd.xlane.f32.xlu0 %v132_v0  ;;  %s173_s26 = sshll.u32 %s131_s25, 4  ;;  %s534_s29 = scalar_lea.hbm %s579_s1, %s252_s17  ;;  %s536_s26 = int_to_ptr.vmem [resolvable:$true] %s173_s26 }
  0x39   : > { %s160_s30 = scalar_lea.sflag [#allocation4], %s518_s21  ;;  %s333_s2 = scalar_lea.vmem %s536_s26, 128 }
  0x3a   : > { %p334_p6 = scmp.ne.s32.totalorder %s536_s26, %s333_s2  ;;  %p588_p11 = scmp.ne.s32.totalorder %s583_s18, 0 }
  0x3b   : > { %s402_s10 = smov [#allocation5]  }
  0x3c   : > { %p335_p12 = pnand %p334_p6, %p588_p11  ;;  %s337_s3 = sshll.u32 %s402_s10, 4  ;;  %s338_s3 = int_to_ptr.vmem [resolvable:$false] %s337_s3 }
  0x3d   : > { %s339_s4 = scalar_lea.vmem %s338_s3, 256  ;;  %p340_p7 = scmp.lt.s32.totalorder %s536_s26, %s338_s3 }
  0x3e   : > { %p336_p13 = pneg %p335_p12  ;;  %p341_p10 = scmp.lt.s32.totalorder %s339_s4, %s333_s2 }
  0x40   : > { %p342_p2 = por %p341_p10, %p340_p7 }
  0x42   : > { %p343_p4 = pnand %p342_p2, %p336_p13 }
  0xc5   : > { %v134_v1 = vpop.xlane.xlu0 %133 }
  0xc6   : > { %v135_v2 = vrot.slane %v134_v1, 4 }
  0xc8   : > { %v136_v3 = vadd.f32 %v135_v2, %v134_v1 }
  0xca   : > { %v137_v4 = vrot.slane %v136_v3, 2 }
  0xcc   : > { %v138_v5 = vadd.f32 %v137_v4, %v136_v3 }
  0xce   : > { %v139_v6 = vrot.slane %v138_v5, 1 }
  0xd0   : > { %v140_v7 = vadd.f32 %v139_v6, %v138_v5 }
  0xd2   : > { %v141_v8 = vmul.f32 0.0009765625, %v140_v7 }
  0xd4   : > { %v142_v9 = vsub.f32 %v132_v0, %v141_v8 }
  0xd6   : > { %v143_v10 = vmul.f32 %v142_v9, %v142_v9 }
  0xd8   : > { %144 = vadd.xlane.f32.xlu0 %v143_v10 }
 0x165   : > { %v145_v11 = vpop.xlane.xlu0 %144 }
 0x166   : > { %v146_v12 = vrot.slane %v145_v11, 4 }
 0x168   : > { %v147_v13 = vadd.f32 %v146_v12, %v145_v11 }
 0x16a   : > { %v148_v14 = vrot.slane %v147_v13, 2 }
 0x16c   : > { %v149_v15 = vadd.f32 %v148_v14, %v147_v13 }
 0x16e   : > { %v150_v16 = vrot.slane %v149_v15, 1 }
 0x170   : > { %v151_v17 = vadd.f32 %v150_v16, %v149_v15 }
 0x172   : > { %v152_v18 = vmul.f32 0.0009765625, %v151_v17 }
 0x174   : > { %v153_v19 = vadd.f32 1e-05, %v152_v18 }
 0x176   : > { %301 = vrsqrt.f32 %v153_v19 }
 0x180   : > { %v302_v20 = vpop.eup %301 }
 0x181   : > { %v155_v21 = vmul.f32 %v302_v20, %v132_v0  ;;  %v156_v22 = vmul.f32 %v302_v20, %v141_v8 }
 0x183   : > { %v157_v23 = vsub.f32 %v155_v21, %v156_v22 }
 0x185   : > { %158 = vst [vmem:[%s131_s25] sm:$0xff] %v157_v23 }
 0x186   : > { %346 = shalt.err (!%p343_p4)
}
 0x187   : > { %s347_s5 = scalar_lea.hbm %s534_s29, 128  ;;  %s351_s14 = scalar_lea.hbm %s579_s1, 256 }
 0x188   : > { %p348_p5 = scmp.ne.s32.totalorder %s534_s29, %s347_s5  ;;  %p352_p0 = scmp.lt.u32.totalorder %s534_s29, %s579_s1 }
 0x189   : > { %p353_p1 = scmp.lt.u32.totalorder %s351_s14, %s347_s5  ;;  %p355_p6 = scmp.lt.u32.totalorder %s347_s5, %s534_s29 }
 0x18a   : > { %p349_p8 = pnand %p348_p5, %p588_p11 }
 0x18b   : > { %p354_p3 = por %p353_p1, %p352_p0 }
 0x18c   : > { %p350_p9 = pneg %p349_p8 }
 0x18d   : > { %p356_p12 = por %p355_p6, %p354_p3 }
 0x18f   : > { %p357_p13 = pnand %p356_p12, %p350_p9 }
 0x191   : > { %360 = shalt.err (!%p357_p13)
}
 0x192   : > { %257 = dma.vmem_to_hbm [thread:$0]  (%p588_p11), %s536_s26, 128, %s534_s29, %s160_s30  }
 0x193 PF: > { %s185_s21 = sand.u32 1, %s387_s6   ;;  %p589_p7 = scmp.ne.s32.totalorder %s584_s19, 0 }
 0x194   : > { %p590_p10 = scmp.ge.s32.totalorder %s399_s9, 2  ;;  %s186_s22 = scalar_lea.sflag [#allocation4], %s185_s21 }
 0x196   : > { %p264_p2 = pnand %p590_p10, %p589_p7 }
 0x198   : > { %382 = dma.done.wait (!%p264_p2), %s186_s22, 128  }
 0x199   : > { %384 = vsyncadd (!%p264_p2), %s186_s22, 4294967168  ;;  %p14_p4 = scmp.ge.s32.totalorder %s438_s12, 4   ;;  %s591_s6 = smov %s391_s7 }
 0x19a   : > { %s592_s7 = smov %s395_s8  ;;  %s593_s8 = smov %s450_s15 }
 0x19b   : > { %s594_s9 = smov %s438_s12  ;;  %16 = sbr.rel (!%p14_p4) target bundleno = 5 (0x5), region = 69 }
 0x1a2   :  { %191 = vsyncpa [#allocation3], 1 }
 0x1a3   :  { %193 = vsyncpa [#allocation3 + $0x1], 1 }
 0x1a4   :  { %194 = vsyncpa [#allocation4], 1 }
 0x1a5   :  { %196 = vsyncpa [#allocation4 + $0x1], 1 }

</bundles_post_ra>
